<compile_context>
chip_gen: v7x
topology: tpu7x:2x2x1
jax: 0.10.0
libtpu: 0.0.40
codegen_flags: <defaults>
</compile_context>

<pallas_src>
import functools

import jax
import jax.numpy as jnp
from jax.experimental import pallas as pl
from jax.experimental.pallas import tpu as pltpu


_VMEM_LIMIT = 48 * 1024 * 1024      # sized for v7x (64 MiB/TC); v5e/v6e have 128 MiB
_ROW_INVALID = -(1 << 28)           # sentinel: padded rows excluded from amax
_COL_INVALID = 1 << 28              # sentinel: padded lanes excluded from amax


def _cdiv(a, b):
    return -(-a // b)


def _round_up(x, m):
    return _cdiv(x, m) * m


def _choose_tm(M, Kc, Fo, *, has_resid, out_itemsize, max_tm=1024, min_grid=2):
    """Row-tile: minimal M padding, >= min_grid steps when M allows (v7x has
    2 TensorCores), and a per-step VMEM budget that also fits v7x."""
    per_row = 2 * (2 * Kc + out_itemsize * Fo + 4)        # X bf16, out, row_t (dbl-buffered)
    if has_resid:
        per_row += 2 * 4 * Fo                             # f32 residual tile
    fixed = 2 * (2 * Kc * Fo + 8 * Fo) + (256 << 10)      # resident W / bias / ph + slack
    cap = max(16, ((_VMEM_LIMIT * 3) // 4 - fixed) // max(per_row, 1))
    hi = max(16, min(max_tm, cap))
    n_tiles = max(_cdiv(M, hi), min(min_grid, _cdiv(M, 16)))
    return _round_up(_cdiv(M, n_tiles), 16)


def _choose_quant_tile(Mp, tm, Fo, itemsize, target_bytes=4 << 20):
    """Quant-pass tile: decoupled from the matmul tile, as large as sensible."""
    n = Mp // tm
    best = 1
    for d in range(1, n + 1):
        if n % d == 0 and d * tm * Fo * itemsize <= target_bytes:
            best = d
    return best * tm


# ----------------------------------------------------------------------------
# Kernel 1: fused matmul + bias (+ optional residual subtract) + masked amax.
#   decoder : out = X @ W + bias
#   residual: out = resid - X @ W
# MXU operands are bf16, accumulation / epilogue / amax are f32, the slab is
# stored as bf16.  amax mask: t_lo <= row_t + ph < t_hi.
# ----------------------------------------------------------------------------
def _mm_bias_amax_kernel(row_t_ref, ph_ref, x_ref, w_ref, bias_ref,
                         o_ref, amax_ref, *, t_lo, t_hi):
    acc = jnp.dot(x_ref[...], w_ref[...], preferred_element_type=jnp.float32)
    val = acc + bias_ref[...]
    o_ref[...] = val.astype(o_ref.dtype)
    t = row_t_ref[...] + ph_ref[...]                     # (tm,1)+(1,Fo) -> (tm,Fo)
    mask = jnp.logical_and(t >= t_lo, t < t_hi)
    amax_ref[...] = jnp.max(jnp.where(mask, jnp.abs(val), 0.0),
                            axis=0, keepdims=True)[None]


def _mm_sub_amax_kernel(row_t_ref, ph_ref, x_ref, w_ref, resid_ref,
                        o_ref, amax_ref, *, t_lo, t_hi):
    acc = jnp.dot(x_ref[...], w_ref[...], preferred_element_type=jnp.float32)
    val = resid_ref[...] - acc
    o_ref[...] = val.astype(o_ref.dtype)
    t = row_t_ref[...] + ph_ref[...]
    mask = jnp.logical_and(t >= t_lo, t < t_hi)
    amax_ref[...] = jnp.max(jnp.where(mask, jnp.abs(val), 0.0),
                            axis=0, keepdims=True)[None]


def fused_matmul_amax(x, w, row_t, ph_cols, *, bias=None, resid=None,
                      t_lo, t_hi, out_dtype=jnp.bfloat16, min_grid=2):
    """x:(M,Kc) bf16, w:(Kc,Fo) bf16, row_t:(M,1) i32, ph_cols:(1,Fo) i32,
    bias:(1,Fo) f32 | None, resid:(M,Fo) f32 | None.
    Returns (slab (Mp,Fo) out_dtype, amax_tiles (grid,1,Fo) f32, tm)."""
    M, Kc = x.shape
    Fo = w.shape[1]
    tm = _choose_tm(M, Kc, Fo, has_resid=resid is not None,
                    out_itemsize=jnp.dtype(out_dtype).itemsize,
                    min_grid=min_grid)
    Mp = _round_up(M, tm)
    grid = Mp // tm
    if Mp != M:
        pad = Mp - M
        x = jnp.pad(x, ((0, pad), (0, 0)))
        row_t = jnp.pad(row_t, ((0, pad), (0, 0)), constant_values=_ROW_INVALID)
        if resid is not None:
            resid = jnp.pad(resid, ((0, pad), (0, 0)))

    # TODO(synk): pipeline_mode=pl.Buffered(1) on the constant W / bias / ph
    # blocks would halve their VMEM footprint (they are never re-DMA'd);
    # omitted pending verification of Buffered(1) support on this JAX version.
    in_specs = [
        pl.BlockSpec((tm, 1), lambda i: (i, 0)),       # row_t
        pl.BlockSpec((1, Fo), lambda i: (0, 0)),       # ph_cols (constant)
        pl.BlockSpec((tm, Kc), lambda i: (i, 0)),      # X
        pl.BlockSpec((Kc, Fo), lambda i: (0, 0)),      # W (constant)
    ]
    args = [row_t, ph_cols, x, w]
    if resid is None:
        assert bias is not None
        kern = functools.partial(_mm_bias_amax_kernel, t_lo=t_lo, t_hi=t_hi)
        in_specs.append(pl.BlockSpec((1, Fo), lambda i: (0, 0)))    # bias (constant)
        args.append(bias)
    else:
        kern = functools.partial(_mm_sub_amax_kernel, t_lo=t_lo, t_hi=t_hi)
        in_specs.append(pl.BlockSpec((tm, Fo), lambda i: (i, 0)))   # residual
        args.append(resid)

    slab, amax_tiles = pl.pallas_call(
        kern,
        out_shape=(jax.ShapeDtypeStruct((Mp, Fo), out_dtype),
                   jax.ShapeDtypeStruct((grid, 1, Fo), jnp.float32)),
        grid_spec=pltpu.PrefetchScalarGridSpec(
            num_scalar_prefetch=0,
            grid=(grid,),
            in_specs=in_specs,
            out_specs=(pl.BlockSpec((tm, Fo), lambda i: (i, 0)),
                       pl.BlockSpec((1, 1, Fo), lambda i: (i, 0, 0)))),
        compiler_params=pltpu.CompilerParams(
            dimension_semantics=("parallel",),
            vmem_limit_bytes=_VMEM_LIMIT),
    )(*args)
    return slab, amax_tiles, tm


# ----------------------------------------------------------------------------
# Kernel 2: per-tensor symmetric activation fake-quant (second pass; the scale
# is GLOBAL, reduced in the wrapper from the fused per-tile amax of pass 1).
# ----------------------------------------------------------------------------
def _act_fq_kernel(scale_ref, y_ref, o_ref, *, qmin, qmax):
    scale = scale_ref[0]
    inv_scale = scale_ref[1]
    v = y_ref[...].astype(jnp.float32)
    # TODO(synk): jnp.round is round-half-to-even; verify against the reference
    # activation observer's rounding mode / qmin-qmax convention.
    q = jnp.clip(jnp.round(v * inv_scale), qmin, qmax) * scale
    o_ref[...] = q.astype(o_ref.dtype)


def act_fake_quant_slab(slab, amax, *, n_bits, tile_m):
    """Fake-quantize a (Mp, Fo) bf16 slab with a global abs-max."""
    Mp, Fo = slab.shape
    qmax = float(2 ** (n_bits - 1) - 1)
    qmin = -float(2 ** (n_bits - 1))
    scale = jnp.maximum(amax.astype(jnp.float32) / qmax, 1e-12)
    sc = jnp.stack([scale, 1.0 / scale]).astype(jnp.float32)    # (2,) -> SMEM
    return pl.pallas_call(
        functools.partial(_act_fq_kernel, qmin=qmin, qmax=qmax),
        out_shape=jax.ShapeDtypeStruct((Mp, Fo), slab.dtype),
        grid_spec=pltpu.PrefetchScalarGridSpec(
            num_scalar_prefetch=0,
            grid=(Mp // tile_m,),
            in_specs=[
                pl.BlockSpec(memory_space=pltpu.MemorySpace.SMEM),
                pl.BlockSpec((tile_m, Fo), lambda i: (i, 0)),
            ],
            out_specs=pl.BlockSpec((tile_m, Fo), lambda i: (i, 0))),
        compiler_params=pltpu.CompilerParams(
            dimension_semantics=("parallel",),
            vmem_limit_bytes=_VMEM_LIMIT),
    )(sc, slab)


# ----------------------------------------------------------------------------
# Weight fake-quant: plain jnp (weights are a few KB; Pallas buys nothing).
# ----------------------------------------------------------------------------
def weight_fake_quant(w, *, ch_axis, n_bits):
    qmax = float(2 ** (n_bits - 1) - 1)
    qmin = -float(2 ** (n_bits - 1))
    axes = tuple(a for a in range(w.ndim) if a != ch_axis)
    scale = jnp.max(jnp.abs(w), axis=axes, keepdims=True) / qmax
    scale = jnp.maximum(scale, 1e-12)
    return jnp.clip(jnp.round(w / scale), qmin, qmax) * scale


# ----------------------------------------------------------------------------
# ConvTr1dDecoderQ forward (module equivalent)
# ----------------------------------------------------------------------------
class ConvTr1dDecoderQPallas:
    def __init__(self, w, bias, rw, *, stride, padding=0, output_padding=0,
                 n_combiner=1, weight_n_bits=8, act_n_bits=8, out_act_n_bits=8):
        # w : ConvTranspose1d weight (Cin, Cout, K);  bias : (Cout,)
        # rw: residual_encoder Conv1d weight (Cin, Cout, K), no bias
        assert n_combiner in (1, 2)
        # TODO(synk): n_combiner > 2 is shape-inconsistent in the reference
        # module (Y - Y_q shapes diverge); not implemented.
        self.w = jnp.asarray(w, jnp.float32)
        self.bias = jnp.asarray(bias, jnp.float32)
        self.rw = jnp.asarray(rw, jnp.float32)
        self.Cin, self.Cout, self.K = w.shape
        self.stride = stride
        self.padding = padding
        self.output_padding = output_padding
        self.n_combiner = n_combiner
        self.weight_n_bits = weight_n_bits
        self.act_n_bits = act_n_bits
        self.out_act_n_bits = out_act_n_bits

    # -- per-forward weight prep (hoisted out of the combiner loop) -----------
    def _prep_decoder_weights(self):
        # TODO(synk): int8-operand MXU path for v5e/v6e (operands are already
        # on an 8-bit grid after fake-quant); kept bf16 since v7x's MXU has no
        # integer mode.
        w_q = weight_fake_quant(self.w, ch_axis=1, n_bits=self.weight_n_bits)
        C, Cout, K, s = self.Cin, self.Cout, self.K, self.stride
        Km = _cdiv(K, s)
        # Combined phase weights: W[(m, c), (ph, co)] = w_q[c, co, ph + m*s]
        w_ext = jnp.pad(w_q, ((0, 0), (0, 0), (0, Km * s - K)))
        w_r = w_ext.reshape(C, Cout, Km, s)
        W = jnp.transpose(w_r, (2, 0, 3, 1)).reshape(Km * C, s * Cout)
        F = s * Cout
        Fp = _round_up(F, 128)                          # lane-dense decoder output
        W_pad = jnp.pad(W, ((0, 0), (0, Fp - F))).astype(jnp.bfloat16)
        bias_pad = jnp.pad(jnp.tile(self.bias, (s,)).reshape(1, F),
                           ((0, 0), (0, Fp - F))).astype(jnp.float32)
        return W_pad, bias_pad

    def _prep_residual_weights(self):
        rw_q = weight_fake_quant(self.rw, ch_axis=0, n_bits=self.weight_n_bits)
        # W[(k, co), ci] = rw_q[ci, co, k]; output kept at the true Cin lane
        # width (no 128-lane padding: avoids Fp/Cin x residual reads + stores).
        return jnp.transpose(rw_q, (2, 1, 0)).reshape(
            self.K * self.Cout, self.Cin).astype(jnp.bfloat16)

    # -- polyphase ConvTranspose1d + bias + fused amax + fake-quant -----------
    def _conv_transpose(self, x_blc, W_dec, bias_dec, row_t, ph_cols, fq_bits):
        B, L, C = x_blc.shape
        K, s, p, op = self.K, self.stride, self.padding, self.output_padding
        Cout = self.Cout
        Lo = (L - 1) * s + K - 2 * p + op
        Km = _cdiv(K, s)
        J = L + Km

        # Shared polyphase taps: X[b*J + j, m*C + c] = x[b, j - m, c]
        # TODO(synk): build these shifted taps in-kernel (halo pl.ds reads on a
        # single x copy) to remove the Km x duplicated HBM writes+reads.
        xb = x_blc.astype(jnp.bfloat16)
        x_pad = jnp.pad(xb, ((0, 0), (Km - 1, Km), (0, 0)))
        taps = jnp.concatenate(
            [x_pad[:, Km - 1 - m: Km - 1 - m + J, :] for m in range(Km)],
            axis=-1)                                    # (B, J, Km*C)
        X = taps.reshape(B * J, Km * C)

        F = s * Cout
        Fp = W_dec.shape[1]
        slab, amax_tiles, tm = fused_matmul_amax(
            X, W_dec, row_t, ph_cols, bias=bias_dec, t_lo=p, t_hi=p + Lo)
        Mp = slab.shape[0]

        if fq_bits is not None:
            amax = jnp.max(amax_tiles)                  # tiny (grid,1,Fp) reduce
            tq = _choose_quant_tile(Mp, tm, Fp, slab.dtype.itemsize)
            slab = act_fake_quant_slab(slab, amax, n_bits=fq_bits, tile_m=tq)

        # De-interleave phases + crop.  TODO(synk): fold this (phase,Cout)->time
        # relayout into the quant kernel's out_spec to drop one more XLA pass.
        y = slab[:B * J, :F].reshape(B, J, s, Cout).reshape(B, J * s, Cout)
        return y[:, p: p + Lo, :]                       # (B, Lo, Cout) bf16

    # -- residual encoder Conv1d, fused subtract + amax, fake-quant -----------
    def _residual_encode(self, xt, y, W_res):
        B, Lo2, Cout = y.shape
        Li, Cin = xt.shape[1], xt.shape[2]
        K, s = self.K, self.stride
        Lenc = (Lo2 - K) // s + 1
        assert Lenc == Li, "residual encoder output length must match input"
        M = B * Lenc

        # Strided im2col: X[b*Lenc + l, k*Cout + co] = y[b, l*s + k, co]
        # TODO(synk): build in-kernel (strided pl.ds reads) to avoid the K x
        # duplicated HBM traffic.
        taps = jnp.concatenate(
            [y[:, k: k + (Lenc - 1) * s + 1: s, :] for k in range(K)],
            axis=-1)                                    # (B, Lenc, K*Cout)
        X = taps.reshape(M, K * Cout).astype(jnp.bfloat16)
        resid = xt.reshape(B * Li, Cin).astype(jnp.float32)

        row_t = jnp.zeros((M, 1), jnp.int32)            # all rows valid
        ph_cols = jnp.zeros((1, Cin), jnp.int32)
        slab, amax_tiles, tm = fused_matmul_amax(
            X, W_res, row_t, ph_cols, resid=resid, t_lo=0, t_hi=1)
        Mp = slab.shape[0]

        amax = jnp.max(amax_tiles)
        tq = _choose_quant_tile(Mp, tm, Cin, slab.dtype.itemsize)
        q = act_fake_quant_slab(slab, amax, n_bits=self.act_n_bits, tile_m=tq)
        return q[:M, :].reshape(B, Lenc, Cin)           # (B, Li, Cin) bf16

    def __call__(self, x):
        # x: (B, Cin, Li) — PyTorch NCL layout
        B, Cin, Li = x.shape
        s, K = self.stride, self.K
        Km = _cdiv(K, s)
        J = Li + Km
        Cout = self.Cout

        xt = jnp.transpose(x, (0, 2, 1)).astype(jnp.float32)    # (B, L, C)

        # Hoisted: weights + constant index arrays, built once, reused by every
        # combiner step (both decoder calls see the same L).
        W_dec, bias_dec = self._prep_decoder_weights()
        F = s * Cout
        Fp = W_dec.shape[1]
        row_t = jnp.tile(jnp.arange(J, dtype=jnp.int32) * s, B).reshape(B * J, 1)
        cols = jnp.arange(Fp, dtype=jnp.int32)
        ph_cols = jnp.where(cols < F, cols // Cout,
                            jnp.int32(_COL_INVALID)).reshape(1, Fp)

        # y = activation_fake_quantize(conv_transpose1d(x) + bias)
        y = self._conv_transpose(xt, W_dec, bias_dec, row_t, ph_cols,
                                 self.out_act_n_bits)            # (B, Lo, Cout)
        if self.n_combiner == 1:
            return jnp.transpose(y, (0, 2, 1)).astype(jnp.float32)

        W_res = self._prep_residual_weights()
        outs = [y]
        for _ in range(1, self.n_combiner):
            # Y1 = act_fq(x - conv1d(y));  y = act_fq(conv_tr1d(Y1) + bias)
            Y1 = self._residual_encode(xt, y, W_res)             # (B, Li, Cin)
            y = self._conv_transpose(Y1, W_dec, bias_dec, row_t, ph_cols,
                                     self.out_act_n_bits)
            outs.append(y)

        # torch.stack(outs): (n_combiner, B, Cout, Lo)
        return jnp.stack(
            [jnp.transpose(o, (0, 2, 1)).astype(jnp.float32) for o in outs])


# ----------------------------------------------------------------------------
# Demo
# ----------------------------------------------------------------------------
if __name__ == "__main__":
    B, Cin, Li = 2, 8, 12
    Cout, K, stride = 16, 4, 2
    n_combiner = 2

    key = jax.random.PRNGKey(0)
    kw, kb, kr, kx = jax.random.split(key, 4)
    # ConvTranspose1d(Cin, Cout, K, stride): weight (Cin, Cout, K), bias (Cout,)
    w = jax.random.normal(kw, (Cin, Cout, K), jnp.float32) * 0.1
    bias = jax.random.normal(kb, (Cout,), jnp.float32) * 0.1
    # ResidualErrorBlock Conv1d(Cout -> Cin, K, stride, bias=False): (Cin, Cout, K)
    rw = jax.random.normal(kr, (Cin, Cout, K), jnp.float32) * 0.1
    x = jax.random.normal(kx, (B, Cin, Li), jnp.float32)

    module = ConvTr1dDecoderQPallas(
        w, bias, rw, stride=stride, padding=0, output_padding=0,
        n_combiner=n_combiner, weight_n_bits=8, act_n_bits=8, out_act_n_bits=8)

    out = module(x)
    out = jax.block_until_ready(out)

    Lo = (Li - 1) * stride + K
    expected = (n_combiner, B, Cout, Lo)
    assert out.shape == expected, (out.shape, expected)
    assert out.dtype == jnp.float32
    assert bool(jnp.all(jnp.isfinite(out)))
    print("KERNEL_OK")
</pallas_src>

<mosaic_0001>
module attributes {stable_mosaic.version = 11 : i64} {
  func.func @_mm_bias_amax_kernel(%arg0: i32, %arg1: memref<16x1xi32, #tpu.memory_space<vmem>>, %arg2: memref<1x128xi32, #tpu.memory_space<vmem>>, %arg3: memref<16x16xbf16, #tpu.memory_space<vmem>>, %arg4: memref<16x128xbf16, #tpu.memory_space<vmem>>, %arg5: memref<1x128xf32, #tpu.memory_space<vmem>>, %arg6: memref<16x128xbf16, #tpu.memory_space<vmem>>, %arg7: memref<1x1x128xf32, #tpu.memory_space<vmem>>) attributes {dimension_semantics = [#tpu.dimension_semantics<parallel>], iteration_bounds = array<i64: 2>, scalar_prefetch = 0 : i64, scratch_operands = 0 : i64, tpu.core_type = #tpu.core_type<tc>, window_params = [{transform_indices = @transform_0, window_bounds = array<i64: 16, 1>}, {pipeline_mode = #tpu.pipeline_mode<synchronous>, transform_indices = @transform_1, window_bounds = array<i64: 1, 128>}, {transform_indices = @transform_2, window_bounds = array<i64: 16, 16>}, {pipeline_mode = #tpu.pipeline_mode<synchronous>, transform_indices = @transform_3, window_bounds = array<i64: 16, 128>}, {pipeline_mode = #tpu.pipeline_mode<synchronous>, transform_indices = @transform_4, window_bounds = array<i64: 1, 128>}, {transform_indices = @transform_5, window_bounds = array<i64: 16, 128>}, {transform_indices = @transform_6, window_bounds = array<i64: 1, 1, 128>}]} {
    %c0 = arith.constant 0 : index
    %c0_0 = arith.constant 0 : index
    %0 = vector.load %arg3[%c0, %c0_0] : memref<16x16xbf16, #tpu.memory_space<vmem>>, vector<16x16xbf16>
    %c0_1 = arith.constant 0 : index
    %c0_2 = arith.constant 0 : index
    %1 = vector.load %arg4[%c0_1, %c0_2] : memref<16x128xbf16, #tpu.memory_space<vmem>>, vector<16x128xbf16>
    %cst = arith.constant dense<0.000000e+00> : vector<16x128xf32>
    %2 = tpu.matmul %0, %1, %cst {dimension_numbers = #tpu.dot_dimension_numbers<[1], [0], [0], [1], [0, 0, 1, 1], [], []>} : vector<16x16xbf16>, vector<16x128xbf16>, vector<16x128xf32> -> vector<16x128xf32>
    %c0_3 = arith.constant 0 : index
    %c0_4 = arith.constant 0 : index
    %3 = vector.load %arg5[%c0_3, %c0_4] : memref<1x128xf32, #tpu.memory_space<vmem>>, vector<1x128xf32>
    %4 = vector.broadcast %3 : vector<1x128xf32> to vector<16x128xf32>
    %5 = arith.addf %2, %4 : vector<16x128xf32>
    %6 = arith.truncf %5 : vector<16x128xf32> to vector<16x128xbf16>
    %c0_5 = arith.constant 0 : index
    %c0_6 = arith.constant 0 : index
    %7 = vector.load %arg6[%c0_5, %c0_6] : memref<16x128xbf16, #tpu.memory_space<vmem>>, vector<16x128xbf16>
    tpu.vector_store %arg6[%c0_5, %c0_6], %6 {strides = array<i32>} : memref<16x128xbf16, #tpu.memory_space<vmem>>, vector<16x128xbf16>,
    %c0_7 = arith.constant 0 : index
    %c0_8 = arith.constant 0 : index
    %8 = vector.load %arg1[%c0_7, %c0_8] : memref<16x1xi32, #tpu.memory_space<vmem>>, vector<16x1xi32>
    %c0_9 = arith.constant 0 : index
    %c0_10 = arith.constant 0 : index
    %9 = vector.load %arg2[%c0_9, %c0_10] : memref<1x128xi32, #tpu.memory_space<vmem>>, vector<1x128xi32>
    %10 = vector.broadcast %8 : vector<16x1xi32> to vector<16x128xi32>
    %11 = vector.broadcast %9 : vector<1x128xi32> to vector<16x128xi32>
    %12 = arith.addi %10, %11 : vector<16x128xi32>
    %c0_i32 = arith.constant 0 : i32
    %13 = vector.broadcast %c0_i32 : i32 to vector<16x128xi32>
    %14 = arith.cmpi sge, %12, %13 : vector<16x128xi32>
    %c26_i32 = arith.constant 26 : i32
    %15 = vector.broadcast %c26_i32 : i32 to vector<16x128xi32>
    %16 = arith.cmpi slt, %12, %15 : vector<16x128xi32>
    %17 = arith.andi %14, %16 : vector<16x128xi1>
    %18 = math.absf %5 : vector<16x128xf32>
    %cst_11 = arith.constant 0.000000e+00 : f32
    %19 = vector.broadcast %cst_11 : f32 to vector<16x128xf32>
    %20 = arith.select %17, %18, %19 : vector<16x128xi1>, vector<16x128xf32>
    %cst_12 = arith.constant dense<0xFF800000> : vector<128xf32>
    %21 = vector.multi_reduction <maximumf>, %20, %cst_12 [0] : vector<16x128xf32> to vector<128xf32>
    %22 = vector.shape_cast %21 : vector<128xf32> to vector<1x128xf32>
    %23 = vector.shape_cast %22 : vector<1x128xf32> to vector<1x1x128xf32>
    %c0_13 = arith.constant 0 : index
    %c0_14 = arith.constant 0 : index
    %c0_15 = arith.constant 0 : index
    %24 = vector.load %arg7[%c0_13, %c0_14, %c0_15] : memref<1x1x128xf32, #tpu.memory_space<vmem>>, vector<1x1x128xf32>
    tpu.vector_store %arg7[%c0_13, %c0_14, %c0_15], %23 {strides = array<i32>} : memref<1x1x128xf32, #tpu.memory_space<vmem>>, vector<1x1x128xf32>,
    return
  }
  func.func @transform_0(%arg0: i32) -> (i32, i32) {
    %c0_i32 = arith.constant 0 : i32
    %c0_i32_0 = arith.constant 0 : i32
    return %arg0, %c0_i32 : i32, i32
  }
  func.func @transform_1(%arg0: i32) -> (i32, i32) {
    %c0_i32 = arith.constant 0 : i32
    %c0_i32_0 = arith.constant 0 : i32
    %c0_i32_1 = arith.constant 0 : i32
    return %c0_i32, %c0_i32_0 : i32, i32
  }
  func.func @transform_2(%arg0: i32) -> (i32, i32) {
    %c0_i32 = arith.constant 0 : i32
    %c0_i32_0 = arith.constant 0 : i32
    return %arg0, %c0_i32 : i32, i32
  }
  func.func @transform_3(%arg0: i32) -> (i32, i32) {
    %c0_i32 = arith.constant 0 : i32
    %c0_i32_0 = arith.constant 0 : i32
    %c0_i32_1 = arith.constant 0 : i32
    return %c0_i32, %c0_i32_0 : i32, i32
  }
  func.func @transform_4(%arg0: i32) -> (i32, i32) {
    %c0_i32 = arith.constant 0 : i32
    %c0_i32_0 = arith.constant 0 : i32
    %c0_i32_1 = arith.constant 0 : i32
    return %c0_i32, %c0_i32_0 : i32, i32
  }
  func.func @transform_5(%arg0: i32) -> (i32, i32) {
    %c0_i32 = arith.constant 0 : i32
    %c0_i32_0 = arith.constant 0 : i32
    return %arg0, %c0_i32 : i32, i32
  }
  func.func @transform_6(%arg0: i32) -> (i32, i32, i32) {
    %c0_i32 = arith.constant 0 : i32
    %c0_i32_0 = arith.constant 0 : i32
    %c0_i32_1 = arith.constant 0 : i32
    return %arg0, %c0_i32, %c0_i32_0 : i32, i32, i32
  }
}

</mosaic_0001>

<bundles_post_ra>
// kernel: tpu_custom_call.1
= control target key start
LH: loop header
LB: loop body
LE: loop exit
PB: predicated region body
PF: predicated region fallthrough
CT: control target
= control target key end

     0   :  { %12 = vsyncpa [#allocation3], 0  ;;  %s905_s0 = inlined_call_operand.vmem [shape: s32[32,1], index: 0, kind: input, shape index: {}]   ;;  %s906_s1 = inlined_call_operand.vmem [shape: s32[1,128], index: 1, kind: input, shape index: {}]   ;;  %s907_s2 = inlined_call_operand.vmem [shape: bf16[32,16], index: 2, kind: input, shape index: {}]   ;;  %s908_s3 = inlined_call_operand.vmem [shape: bf16[16,128], index: 3, kind: input, shape index: {}]   ;;  %s909_s4 = inlined_call_operand.vmem [shape: f32[1,128], index: 4, kind: input, shape index: {}]   ;;  %s910_s5 = inlined_call_operand.hbm [shape: bf16[32,128], index: 5, kind: output, shape index: {0}]   ;;  %s911_s6 = inlined_call_operand.hbm [shape: f32[2,1,128], index: 6, kind: output, shape index: {1}]  }
   0x1   :  { %14 = vsyncpa [#allocation3 + $0x1], 0 }
   0x2   :  { %15 = vsyncpa [#allocation5], 0 }
   0x3   :  { %17 = vsyncpa [#allocation5 + $0x1], 0  ;;  %s757_s21 = smov 0   ;;  %s759_s22 = smov 0  }
   0x4   :  { %s761_s23 = smov 0   ;;  %s763_s24 = smov 0  }
   0x5 LB: > { %s778_s25 = sadd.s32 4294967295, %s713_s24   ;;  %s529_s26 = sadd.s32 4294967294, %s713_s24   ;;  %s713_s24 = sphi %s763_s24, %s917_s24   ;;  %s709_s23 = sphi %s761_s23, %s916_s23   ;;  %s705_s22 = sphi %s759_s22, %s915_s22   ;;  %s701_s21 = sphi %s757_s21, %s914_s21  }
   0x6   : > { %s782_s27 = sadd.s32 1, %s713_s24   ;;  %s145_s28 = sadd.s32 1, %s709_s23 }
   0x7   : > { %s142_s29 = ssub.s32 %s713_s24, %s782_s27  ;;  %p155_p0 = scmp.ne.s32.totalorder %s709_s23, %s705_s22 }
   0x8   : > { %p143_p1 = scmp.eq.s32.totalorder %s142_s29, 0  ;;  %p156_p2 = scmp.eq.s32.totalorder %s778_s25, 1 }
   0x9   : > { %p161_p3 = scmp.ne.s32.totalorder %s705_s22, %s701_s21  ;;  %p162_p4 = scmp.eq.s32.totalorder %s529_s26, 1 }
   0xa   : > { %s793_s30 = scalar_select %p143_p1, %s709_s23, %s145_s28  }
   0xb   : > { %p795_p5 = por %p156_p2, %p155_p0  ;;  %p799_p6 = por %p162_p4, %p161_p3 }
   0xc   : > { %p532_p7 = scmp.ge.s32.totalorder %s713_s24, 1  ;;  %p233_p8 = scmp.lt.s32.totalorder %s713_s24, 3 }
   0xe   : > { %p234_p9 = pnand %p532_p7, %p233_p8 }
   0xf   : > { %v617_v0 = vld [vmem:[%s908_s3] sm:$0xff] (!%p234_p9)   ;;  %v715_v1 = vmov (!%p234_p9), 0.0   ;;  %s534_s11 = sshll.u32 (!%p234_p9), %s778_s25, 1  ;;  %vm716_vm0 = vmmov (!%p234_p9), 0   ;;  %v717_v2 = vmov (!%p234_p9), 0   ;;  %vm308_vm1 = vcmask (!%p234_p9), 130048  }
  0x10   : > { %237 = sbr.rel (%p234_p9) target bundleno = 286 (0x11e), region = 40  ;;  %561 = vmatprep.subr.bf16.mxu0 (!%p234_p9), %v715_v1  ;;  %563 = vmatprep.mubr.msk.bf16.mxu0 (!%p234_p9), %vm716_vm0, %v715_v1  ;;  %p273_p10 = scmp.lt.s32.totalorder (!%p234_p9), %s534_s11, 3  ;;  %v544_v7 = vld [vmem:[%s906_s1] ss:$0 sm:$0xff] (!%p234_p9) }
  0x11   : > { %562 = vmatpush3.bf16.msra.mxu0 (!%p234_p9), %v617_v0  ;;  %616 = vset.pattern.permute.xlu0 (!%p234_p9), %v717_v2  ;;  %s816_s20 = sand.u32 (!%p234_p9), 1, %s705_s22   ;;  %v538_v10 = vld [vmem:[%s909_s4] ss:$0 sm:$0xff] (!%p234_p9) }
  0x12   : > { %s533_s29 = sshll.u32 (!%p234_p9), %s816_s20, 3  ;;  %s397_s17 = scalar_lea.sflag (!%p234_p9), [#allocation3], %s816_s20 }
  0x17   : > { %s919_s11 = smov (!%p273_p10, %s534_s11), 3 }
  0x18   : > { %s537_s12 = sshll.u32 %s919_s11, 2  ;;  %s535_s13 = sshll.u32 %s919_s11, 3 }
  0x19   : > { %s282_s16 = scalar_lea.vmem %s907_s2, %s537_s12  ;;  %s276_s19 = scalar_lea.vmem %s905_s0, %s535_s13 }
  0x1a   : > { %v618_v3 = vld [vmem:[%s282_s16] sm:$0xff]   ;;  %v364_v5 = vld [vmem:[%s276_s19 + $0x8] sm:$0xff]  ;;  %s265_s11 = scalar_lea.vmem [#allocation2], %s533_s29  ;;  %s553_s13 = sshll.u32 %s778_s25, 7 }
  0x1b   : > { %v363_v4 = vld [vmem:[%s276_s19] sm:$0xff]  ;;  %564 = vmatmul.mubr.msk.bf16.vlgmr.msra.gmra.mrb[0].mxu0 %vm308_vm1, %v618_v3  ;;  %s414_s12 = sshll.u32 %s265_s11, 4  ;;  %s831_s16 = scalar_lea.hbm %s910_s5, %s553_s13  ;;  %s826_s12 = int_to_ptr.vmem [resolvable:$true] %s414_s12 }
  0x1c   : > { %367 = vperm.xlu0 %616, %v363_v4   ;;  %s619_s18 = scalar_lea.vmem %s826_s12, 128  ;;  %s718_s19 = smov [#allocation2]  }
  0x1d   : > { %p620_p11 = scmp.ne.s32.totalorder %s826_s12, %s619_s18  ;;  %s623_s26 = sshll.u32 %s718_s19, 4  ;;  %s624_s26 = int_to_ptr.vmem [resolvable:$false] %s623_s26 }
  0x1e   : > { %s625_s28 = scalar_lea.vmem %s624_s26, 256  ;;  %p626_p0 = scmp.lt.s32.totalorder %s826_s12, %s624_s26 }
  0x1f   : > { %p621_p12 = pnand %p620_p11, %p795_p5  ;;  %p627_p1 = scmp.lt.s32.totalorder %s625_s28, %s619_s18 }
  0x20   : > { %370 = vperm.xlu0 %616, %v364_v5  }
  0x21   : > { %p622_p13 = pneg %p621_p12  ;;  %p628_p2 = por %p627_p1, %p626_p0 }
  0x23   : > { %p629_p3 = pnand %p628_p2, %p622_p13 }
  0x9b   : > { %v368_v6 = vpop.permute.xlu0 %367 }
  0x9c   : > { %v376_v9 = vadd.s32 %v544_v7, %v368_v6 }
  0x9e   : > { %vm378_vm2 = vcmp.ge.s32.totalorder %v376_v9, 0  ;;  %vm380_vm3 = vcmp.lt.s32.totalorder %v376_v9, 26 }
  0x9f   : > { %v371_v8 = vpop.permute.xlu0 %370  ;;  %vm382_vm6 = vmand %vm378_vm2, %vm380_vm3 }
  0xa0   : > { %v377_v11 = vadd.s32 %v544_v7, %v371_v8 }
  0xa2   : > { %vm379_vm4 = vcmp.ge.s32.totalorder %v377_v11, 0  ;;  %vm381_vm5 = vcmp.lt.s32.totalorder %v377_v11, 26 }
  0xa3   : > { %vm383_vm7 = vmand %vm379_vm4, %vm381_vm5 }
  0xee   : > { %v346_v12 = vpop.f32.mrb[0].mxu0 }
  0xef   : > { %v347_v13 = vadd.f32 %v538_v10, %v346_v12  ;;  %v565_v14 = vpop.f32.mrb[1].mxu0 }
  0xf0   : > { %v349_v15 = vpop.f32.mrb[2].mxu0 }
  0xf1   : > { %v384_v16 = vand.u32 2147483647, %v347_v13  ;;  %v350_v17 = vadd.f32 %v538_v10, %v349_v15  ;;  %v566_v18 = vpop.f32.mrb[3].mxu0 }
  0xf3   : > { %v557_v19 = vpack.c.bf16 %v350_v17, %v347_v13  ;;  %v385_v20 = vand.u32 2147483647, %v350_v17  ;;  %v386_v21 = vsel %vm382_vm6, %v384_v16, 0.0 }
  0xf5   : > { %558 = vst [vmem:[%s265_s11] sm:$0xff] %v557_v19   ;;  %v387_v22 = vsel %vm383_vm7, %v385_v20, 0.0 }
  0xf6   : > { %v388_v23 = vmax.f32 %v386_v21, %v387_v22 }
  0xf7   : > { %632 = shalt.err (!%p629_p3)
}
  0xf8   : > { %s633_s29 = scalar_lea.hbm %s831_s16, 128  ;;  %s637_s11 = scalar_lea.hbm %s910_s5, 256 }
  0xf9   : > { %p634_p4 = scmp.ne.s32.totalorder %s831_s16, %s633_s29  ;;  %p638_p9 = scmp.lt.u32.totalorder %s831_s16, %s910_s5 }
  0xfa   : > { %p639_p10 = scmp.lt.u32.totalorder %s637_s11, %s633_s29  ;;  %p641_p12 = scmp.lt.u32.totalorder %s633_s29, %s831_s16 }
  0xfb   : > { %p635_p7 = pnand %p634_p4, %p795_p5 }
  0xfc   : > { %p640_p11 = por %p639_p10, %p638_p9 }
  0xfd   : > { %p636_p8 = pneg %p635_p7 }
  0xfe   : > { %p642_p13 = por %p641_p12, %p640_p11 }
 0x100   : > { %p643_p0 = pnand %p642_p13, %p636_p8 }
 0x102   : > { %646 = shalt.err (!%p643_p0)
}
 0x103   : > { %s719_s15 = smov 64   ;;  %s720_s18 = smov 4   ;;  %v389_v24 = vrot.slane %v388_v23, 4 }
 0x104   : > { %567 = dma.vmem_to_hbm [thread:$0]  (%p795_p5), %s826_s12, 128, %s831_s16, %s397_s17, %s719_s15, %s719_s15, %s720_s18  }
 0x105   : > { %v390_v25 = vmax.f32 %v388_v23, %v389_v24  ;;  %s548_s19 = sshll.u32 %s778_s25, 4  ;;  %s271_s26 = scalar_lea.vmem [#allocation4], %s816_s20 }
 0x106   : > { %s430_s28 = sshll.u32 %s271_s26, 4  ;;  %s862_s10 = scalar_lea.hbm %s911_s6, %s548_s19  ;;  %s864_s28 = int_to_ptr.vmem [resolvable:$true] %s430_s28 }
 0x107   : > { %v391_v26 = vrot.slane %v390_v25, 2  ;;  %s402_s12 = scalar_lea.sflag [#allocation5], %s816_s20  ;;  %s647_s16 = scalar_lea.vmem %s864_s28, 16 }
 0x108   : > { %p648_p1 = scmp.ne.s32.totalorder %s864_s28, %s647_s16  ;;  %s721_s25 = smov [#allocation4]  }
 0x109   : > { %v392_v27 = vmax.f32 %v390_v25, %v391_v26  ;;  %s651_s17 = sshll.u32 %s721_s25, 4  ;;  %s652_s17 = int_to_ptr.vmem [resolvable:$false] %s651_s17 }
 0x10a   : > { %p649_p2 = pnand %p648_p1, %p795_p5  ;;  %s653_s11 = scalar_lea.vmem %s652_s17, 32 }
 0x10b   : > { %v393_v28 = vrot.slane %v392_v27, 1  ;;  %p654_p4 = scmp.lt.s32.totalorder %s864_s28, %s652_s17  ;;  %p655_p7 = scmp.lt.s32.totalorder %s653_s11, %s647_s16 }
 0x10c   : > { %p650_p3 = pneg %p649_p2 }
 0x10d   : > { %v394_v29 = vmax.f32 %v392_v27, %v393_v28  ;;  %p656_p8 = por %p655_p7, %p654_p4 }
 0x10f   : > { %395 = vst [vmem:[%s271_s26] sm:$0x1] %v394_v29  ;;  %p657_p9 = pnand %p656_p8, %p650_p3 }
 0x111   : > { %660 = shalt.err (!%p657_p9)
}
 0x112   : > { %s661_s20 = scalar_lea.hbm %s862_s10, 16  ;;  %s665_s15 = scalar_lea.hbm %s911_s6, 32 }
 0x113   : > { %p662_p10 = scmp.ne.s32.totalorder %s862_s10, %s661_s20  ;;  %p666_p13 = scmp.lt.u32.totalorder %s862_s10, %s911_s6 }
 0x114   : > { %p667_p0 = scmp.lt.u32.totalorder %s665_s15, %s661_s20  ;;  %p669_p2 = scmp.lt.u32.totalorder %s661_s20, %s862_s10 }
 0x115   : > { %p663_p11 = pnand %p662_p10, %p795_p5 }
 0x116   : > { %p668_p1 = por %p667_p0, %p666_p13 }
 0x117   : > { %p664_p12 = pneg %p663_p11 }
 0x118   : > { %p670_p3 = por %p669_p2, %p668_p1 }
 0x11a   : > { %p671_p4 = pnand %p670_p3, %p664_p12 }
 0x11c   : > { %674 = shalt.err (!%p671_p4)
}
 0x11d   : > { %568 = dma.vmem_to_hbm [thread:$0]  (%p795_p5), %s864_s28, 16, %s862_s10, %s402_s12  }
 0x11e PF: > { %p578_p7 = scmp.ge.s32.totalorder %s713_s24, 2  ;;  %s442_s26 = sand.u32 1, %s701_s21  }
 0x11f   : > { %s443_s29 = scalar_lea.sflag [#allocation3], %s442_s26 }
 0x120   : > { %p572_p8 = pnand %p578_p7, %p799_p6 }
 0x122   : > { %692 = dma.done.wait (!%p572_p8), %s443_s29, 128  }
 0x123   : > { %694 = vsyncadd (!%p572_p8), %s443_s29, 4294967168  ;;  %s452_s9 = scalar_lea.sflag [#allocation5], %s442_s26 }
 0x124   : > { %696 = dma.done.wait (!%p572_p8), %s452_s9, 16  }
 0x125   : > { %698 = vsyncadd (!%p572_p8), %s452_s9, 4294967280  ;;  %p20_p5 = scmp.ge.s32.totalorder %s782_s27, 4   ;;  %s914_s21 = smov %s705_s22 }
 0x126   : > { %s915_s22 = smov %s709_s23  ;;  %s916_s23 = smov %s793_s30 }
 0x127   : > { %s917_s24 = smov %s782_s27  ;;  %22 = sbr.rel (!%p20_p5) target bundleno = 5 (0x5), region = 95 }
 0x12e   :  { %456 = vsyncpa [#allocation3], 1 }
 0x12f   :  { %458 = vsyncpa [#allocation3 + $0x1], 1 }
 0x130   :  { %459 = vsyncpa [#allocation5], 1 }
 0x131   :  { %461 = vsyncpa [#allocation5 + $0x1], 1 }

</bundles_post_ra>
